<compile_context>
chip_gen: v7x
topology: tpu7x:2x2x1
jax: 0.10.0
libtpu: 0.0.40
codegen_flags: <defaults>
</compile_context>

<pallas_src>
import functools

import jax
import jax.numpy as jnp
from jax.experimental import pallas as pl
from jax.experimental.pallas import tpu as pltpu


def _round_up(x, m):
    return ((x + m - 1) // m) * m


def _mean_combiner_kernel(rs_ref, out_ref, acc_ref, *, inv_n):
    """rs_ref: (TB, TN, R) block; out_ref: (TB, R); acc_ref: (TB, R) f32 scratch."""
    k = pl.program_id(1)

    @pl.when(k == 0)
    def _():
        acc_ref[...] = jnp.zeros_like(acc_ref)

    # Widen in-register only; HBM traffic stays in the input's native dtype.
    acc_ref[...] += jnp.sum(rs_ref[...].astype(jnp.float32), axis=1)

    @pl.when(k == pl.num_programs(1) - 1)
    def _():
        out_ref[...] = (acc_ref[...] * inv_n).astype(out_ref.dtype)


def mean_combiner(
    rs,
    *,
    force_pallas=False,
    block_budget_bytes=8 * 1024 * 1024,     # per input block (2x double-buffered)
    vmem_limit_bytes=32 * 1024 * 1024,       # safe on v5e/v6e (128 MiB) and v7x (64 MiB)
):
    """Mean over dim=1: (B, N, R) -> (B, R). Matches torch.mean(rs, dim=1)."""
    B, N, R = rs.shape
    itemsize = jnp.dtype(rs.dtype).itemsize

    # Tiny problem: fixed pallas_call overhead dominates -> let XLA fuse it.
    if not force_pallas and rs.size * itemsize < (1 << 20):
        return jnp.mean(rs, axis=1)

    # ---- tile selection --------------------------------------------------
    MAX_TB = 256
    row_bytes = N * R * itemsize
    max_rows = block_budget_bytes // max(row_bytes, 1)
    if max_rows >= 8:
        # A full-N block of >=8 rows fits: no context tiling needed.
        TB = min(MAX_TB, (max_rows // 8) * 8, _round_up(B, 8))
        TN = N                      # equal to full dim -> always layout-legal
        N_pad = N
    else:
        # Row too large: tile the context axis, accumulate across k.
        TB = 8
        max_ctx = block_budget_bytes // max(TB * R * itemsize, 1)
        TN = min(max(8, (max_ctx // 8) * 8), _round_up(N, 8))
        N_pad = pl.cdiv(N, TN) * TN

    B_pad = _round_up(B, TB)

    # Zero-pad batch/context; zeros do not perturb the sum and we divide by
    # the true N, so padded context rows are harmless. Padded batch rows are
    # sliced off at the end.
    if B_pad != B or N_pad != N:
        rs = jnp.pad(rs, ((0, B_pad - B), (0, N_pad - N), (0, 0)))

    grid = (B_pad // TB, N_pad // TN)
    kernel = functools.partial(_mean_combiner_kernel, inv_n=float(1.0 / N))

    out = pl.pallas_call(
        kernel,
        out_shape=jax.ShapeDtypeStruct((B_pad, R), rs.dtype),
        grid_spec=pltpu.PrefetchScalarGridSpec(
            num_scalar_prefetch=0,
            grid=grid,
            in_specs=[pl.BlockSpec((TB, TN, R), lambda b, k: (b, k, 0))],
            out_specs=pl.BlockSpec((TB, R), lambda b, k: (b, 0)),
            scratch_shapes=[pltpu.VMEM((TB, R), jnp.float32)],
        ),
        compiler_params=pltpu.CompilerParams(
            dimension_semantics=("parallel", "arbitrary"),
            vmem_limit_bytes=vmem_limit_bytes,
        ),
    )(rs)

    return out[:B]


if __name__ == "__main__":
    # --- test 1: the module's nominal small shape --------------------------
    key = jax.random.PRNGKey(0)
    B, N, R = 2, 8, 32  # batch, num_context_points, r_dim
    rs = jax.random.normal(key, (B, N, R), dtype=jnp.float32)

    out = jax.block_until_ready(mean_combiner(rs, force_pallas=True))
    ref = jnp.mean(rs, axis=1)
    assert out.shape == (B, R)
    assert jnp.allclose(out, ref, atol=1e-5, rtol=1e-5)

    # --- test 2: multi-row (TB-batched) path --------------------------------
    rs2 = jax.random.normal(jax.random.PRNGKey(1), (32, 40, 128), dtype=jnp.float32)
    out2 = jax.block_until_ready(mean_combiner(rs2, force_pallas=True))
    ref2 = jnp.mean(rs2, axis=1)
    assert jnp.allclose(out2, ref2, atol=1e-5, rtol=1e-5)

    # --- test 3: context-axis (N) tiling + padding path ---------------------
    rs3 = jax.random.normal(jax.random.PRNGKey(2), (2, 20, 256), dtype=jnp.float32)
    out3 = jax.block_until_ready(
        mean_combiner(rs3, force_pallas=True, block_budget_bytes=8 * 8 * 256 * 4)
    )
    ref3 = jnp.mean(rs3, axis=1)
    assert jnp.allclose(out3, ref3, atol=1e-5, rtol=1e-5)

    print("KERNEL_OK")
</pallas_src>

<mosaic_0001>
module attributes {stable_mosaic.version = 11 : i64} {
  func.func @_mean_combiner_kernel(%arg0: i32, %arg1: i32, %arg2: memref<8x8x32xf32, #tpu.memory_space<vmem>>, %arg3: memref<8x32xf32, #tpu.memory_space<vmem>>, %arg4: memref<8x32xf32, #tpu.memory_space<vmem>>) attributes {dimension_semantics = [#tpu.dimension_semantics<parallel>, #tpu.dimension_semantics<arbitrary>], iteration_bounds = array<i64: 1, 1>, scalar_prefetch = 0 : i64, scratch_operands = 1 : i64, tpu.core_type = #tpu.core_type<tc>, window_params = [{transform_indices = @transform_0, window_bounds = array<i64: 8, 8, 32>}, {transform_indices = @transform_1, window_bounds = array<i64: 8, 32>}]} {
    %c0_i32 = arith.constant 0 : i32
    %0 = arith.cmpi eq, %arg1, %c0_i32 : i32
    %1 = arith.extui %0 : i1 to i32
    %c0_i32_0 = arith.constant 0 : i32
    %2 = arith.cmpi ne, %1, %c0_i32_0 : i32
    scf.if %2 {
      %cst_9 = arith.constant 0.000000e+00 : f32
      %11 = vector.broadcast %cst_9 : f32 to vector<8x32xf32>
      %c0_10 = arith.constant 0 : index
      %c0_11 = arith.constant 0 : index
      %12 = vector.load %arg4[%c0_10, %c0_11] : memref<8x32xf32, #tpu.memory_space<vmem>>, vector<8x32xf32>
      tpu.vector_store %arg4[%c0_10, %c0_11], %11 {strides = array<i32>} : memref<8x32xf32, #tpu.memory_space<vmem>>, vector<8x32xf32>,
    } else {
    }
    %c0 = arith.constant 0 : index
    %c0_1 = arith.constant 0 : index
    %3 = vector.load %arg4[%c0, %c0_1] : memref<8x32xf32, #tpu.memory_space<vmem>>, vector<8x32xf32>
    %c0_2 = arith.constant 0 : index
    %c0_3 = arith.constant 0 : index
    %c0_4 = arith.constant 0 : index
    %4 = vector.load %arg2[%c0_2, %c0_3, %c0_4] : memref<8x8x32xf32, #tpu.memory_space<vmem>>, vector<8x8x32xf32>
    %cst = arith.constant dense<0.000000e+00> : vector<8x32xf32>
    %5 = vector.multi_reduction <add>, %4, %cst [1] : vector<8x8x32xf32> to vector<8x32xf32>
    %6 = arith.addf %3, %5 : vector<8x32xf32>
    %c0_5 = arith.constant 0 : index
    %c0_6 = arith.constant 0 : index
    %7 = vector.load %arg4[%c0_5, %c0_6] : memref<8x32xf32, #tpu.memory_space<vmem>>, vector<8x32xf32>
    tpu.vector_store %arg4[%c0_5, %c0_6], %6 {strides = array<i32>} : memref<8x32xf32, #tpu.memory_space<vmem>>, vector<8x32xf32>,
    %c0_i32_7 = arith.constant 0 : i32
    %8 = arith.cmpi eq, %arg1, %c0_i32_7 : i32
    %9 = arith.extui %8 : i1 to i32
    %c0_i32_8 = arith.constant 0 : i32
    %10 = arith.cmpi ne, %9, %c0_i32_8 : i32
    scf.if %10 {
      %c0_9 = arith.constant 0 : index
      %c0_10 = arith.constant 0 : index
      %11 = vector.load %arg4[%c0_9, %c0_10] : memref<8x32xf32, #tpu.memory_space<vmem>>, vector<8x32xf32>
      %cst_11 = arith.constant 1.250000e-01 : f32
      %12 = vector.broadcast %cst_11 : f32 to vector<8x32xf32>
      %13 = arith.mulf %11, %12 : vector<8x32xf32>
      %c0_12 = arith.constant 0 : index
      %c0_13 = arith.constant 0 : index
      %14 = vector.load %arg3[%c0_12, %c0_13] : memref<8x32xf32, #tpu.memory_space<vmem>>, vector<8x32xf32>
      tpu.vector_store %arg3[%c0_12, %c0_13], %13 {strides = array<i32>} : memref<8x32xf32, #tpu.memory_space<vmem>>, vector<8x32xf32>,
    } else {
    }
    return
  }
  func.func @transform_0(%arg0: i32, %arg1: i32) -> (i32, i32, i32) {
    %c0_i32 = arith.constant 0 : i32
    %c0_i32_0 = arith.constant 0 : i32
    return %arg0, %arg1, %c0_i32 : i32, i32, i32
  }
  func.func @transform_1(%arg0: i32, %arg1: i32) -> (i32, i32) {
    %c0_i32 = arith.constant 0 : i32
    %c0_i32_0 = arith.constant 0 : i32
    return %arg0, %c0_i32 : i32, i32
  }
}

</mosaic_0001>

<bundles_post_ra>
// kernel: tpu_custom_call.1
= control target key start
LH: loop header
LB: loop body
LE: loop exit
PB: predicated region body
PF: predicated region fallthrough
CT: control target
= control target key end

     0   :  { %6 = vsyncpa [#allocation4], 0  ;;  %s246_s0 = inlined_call_operand.hbm [shape: f32[8,8,32], index: 0, kind: input, shape index: {}]   ;;  %s247_s1 = inlined_call_operand.hbm [shape: f32[8,32], index: 1, kind: output, shape index: {}]  }
   0x1   :  { %7 = vsyncpa [#allocation5], 0  ;;  %s194_s6 = smov [#allocation3]   ;;  %s146_s10 = scalar_lea.hbm %s246_s0, 1024 }
   0x2   :  { %s13_s7 = sshll.u32 %s194_s6, 4  ;;  %p147_p0 = scmp.ne.s32.totalorder %s246_s0, %s146_s10  ;;  %s14_s7 = int_to_ptr.vmem [resolvable:$true] %s13_s7 }
   0x3   :  { %p150_p1 = scmp.lt.u32.totalorder %s146_s10, %s246_s0 }
   0x5   :  { %p152_p2 = pnand %p150_p1, %p147_p0 }
   0x7   :  { %155 = shalt.err (!%p152_p2)
}
   0x8   :  { %s156_s15 = scalar_lea.vmem %s14_s7, 1024  ;;  %p161_p4 = scmp.lt.s32.totalorder %s14_s7, %s14_s7 }
   0x9   :  { %p157_p3 = scmp.ne.s32.totalorder %s14_s7, %s156_s15  ;;  %p162_p5 = scmp.lt.s32.totalorder %s156_s15, %s156_s15 }
   0xb   :  { %p163_p6 = por %p162_p5, %p161_p4 }
   0xd   :  { %p164_p7 = pnand %p163_p6, %p157_p3 }
   0xf   :  { %167 = shalt.err (!%p164_p7)
}
  0x10   :  { %s195_s16 = smov 128   ;;  %s196_s17 = smov 8  }
  0x11   :  { %19 = dma.hbm_to_vmem [thread:$0]  %s246_s0, 1024, %s14_s7, [#allocation4], %s195_s16, %s195_s16, %s196_s17  }
  0x12   :  { %190 = dma.done.wait [#allocation4], 1024  }
  0x13   :  { %191 = vsyncadd [#allocation4], 4294966272  ;;  %vm27_vm0 = vcmask 261120   ;;  %v197_v0 = vmov 0.0   ;;  %v30_v1 = vld [vmem:[#allocation3] sm:$0xff]  ;;  %v31_v2 = vld [vmem:[#allocation3 + $0x8] sm:$0xff] }
  0x14   :  { %28 = vst.msk [vmem:[#allocation2] sm:$0xff] %vm27_vm0, %v197_v0  ;;  %v32_v3 = vld [vmem:[#allocation3 + $0x10] sm:$0xff]  ;;  %v33_v4 = vld [vmem:[#allocation3 + $0x18] sm:$0xff]  ;;  %v34_v5 = vld [vmem:[#allocation3 + $0x20] sm:$0xff]  ;;  %v39_v6 = vsel %vm27_vm0, %v30_v1, 0.0  ;;  %v46_v7 = vsel %vm27_vm0, %v31_v2, 0.0 }
  0x15   :  { %v53_v8 = vsel %vm27_vm0, %v32_v3, 0.0  ;;  %v35_v9 = vld [vmem:[#allocation3 + $0x28] sm:$0xff]  ;;  %v36_v10 = vld [vmem:[#allocation3 + $0x30] sm:$0xff]  ;;  %v37_v11 = vld [vmem:[#allocation3 + $0x38] sm:$0xff]  ;;  %v40_v12 = vrot.slane %v39_v6, 4  ;;  %v47_v13 = vrot.slane %v46_v7, 4 }
  0x16   :  { %v54_v14 = vrot.slane %v53_v8, 4  ;;  %v60_v15 = vsel %vm27_vm0, %v33_v4, 0.0  ;;  %v67_v16 = vsel %vm27_vm0, %v34_v5, 0.0  ;;  %v74_v17 = vsel %vm27_vm0, %v35_v9, 0.0  ;;  %s198_s0 = smov [#allocation6]  }
  0x17   :  { %v81_v18 = vsel %vm27_vm0, %v36_v10, 0.0  ;;  %vm103_vm1 = vcmask 1041409   ;;  %v41_v19 = vadd.f32 %v40_v12, %v39_v6  ;;  %v48_v20 = vadd.f32 %v47_v13, %v46_v7  ;;  %s132_s20 = sshll.u32 %s198_s0, 4  ;;  %s133_s20 = int_to_ptr.vmem [resolvable:$true] %s132_s20 }
  0x18   :  { %v55_v21 = vadd.f32 %v54_v14, %v53_v8  ;;  %v61_v22 = vrot.slane %v60_v15, 4  ;;  %v68_v23 = vrot.slane %v67_v16, 4  ;;  %v75_v24 = vrot.slane %v74_v17, 4  ;;  %s168_s21 = scalar_lea.vmem %s133_s20, 128  ;;  %p173_p9 = scmp.lt.s32.totalorder %s133_s20, %s133_s20 }
  0x19   :  { %v82_v25 = vrot.slane %v81_v18, 4  ;;  %v88_v26 = vsel %vm27_vm0, %v37_v11, 0.0  ;;  %vm105_vm2 = vcmask 1042434   ;;  %v42_v27 = vrot.slane %v41_v19, 2  ;;  %p169_p8 = scmp.ne.s32.totalorder %s133_s20, %s168_s21  ;;  %p174_p10 = scmp.lt.s32.totalorder %s168_s21, %s168_s21 }
  0x1a   :  { %v49_v28 = vrot.slane %v48_v20, 2  ;;  %v56_v29 = vrot.slane %v55_v21, 2  ;;  %v62_v30 = vadd.f32 %v61_v22, %v60_v15  ;;  %v69_v31 = vadd.f32 %v68_v23, %v67_v16 }
  0x1b   :  { %v76_v32 = vadd.f32 %v75_v24, %v74_v17  ;;  %v83_v33 = vadd.f32 %v82_v25, %v81_v18  ;;  %v89_v34 = vrot.slane %v88_v26, 4  ;;  %v43_v35 = vadd.f32 %v42_v27, %v41_v19  ;;  %v29_v5 = vld [vmem:[#allocation2] sm:$0xff]  ;;  %p175_p11 = por %p174_p10, %p173_p9 }
  0x1c   :  { %v50_v36 = vadd.f32 %v49_v28, %v48_v20  ;;  %v57_v37 = vadd.f32 %v56_v29, %v55_v21  ;;  %v63_v38 = vrot.slane %v62_v30, 2  ;;  %v70_v39 = vrot.slane %v69_v31, 2 }
  0x1d   :  { %v77_v40 = vrot.slane %v76_v32, 2  ;;  %v84_v41 = vrot.slane %v83_v33, 2  ;;  %v90_v42 = vadd.f32 %v89_v34, %v88_v26  ;;  %v44_v43 = vrot.slane %v43_v35, 1  ;;  %p176_p12 = pnand %p175_p11, %p169_p8 }
  0x1e   :  { %v51_v44 = vrot.slane %v50_v36, 1  ;;  %v58_v45 = vrot.slane %v57_v37, 1  ;;  %v64_v46 = vadd.f32 %v63_v38, %v62_v30  ;;  %v71_v47 = vadd.f32 %v70_v39, %v69_v31 }
  0x1f   :  { %v78_v48 = vadd.f32 %v77_v40, %v76_v32  ;;  %v85_v49 = vadd.f32 %v84_v41, %v83_v33  ;;  %v91_v50 = vrot.slane %v90_v42, 2  ;;  %v45_v51 = vadd.f32 %v44_v43, %v43_v35 }
  0x20   :  { %v52_v52 = vadd.f32 %v51_v44, %v50_v36  ;;  %v59_v53 = vadd.f32 %v58_v45, %v57_v37  ;;  %v65_v54 = vrot.slane %v64_v46, 1  ;;  %v72_v55 = vrot.slane %v71_v47, 1 }
  0x21   :  { %v79_v56 = vrot.slane %v78_v48, 1  ;;  %v86_v57 = vrot.slane %v85_v49, 1  ;;  %v92_v58 = vadd.f32 %v91_v50, %v90_v42  ;;  %vm107_vm3 = vcmask 1043459  }
  0x22   :  { %v66_v59 = vadd.f32 %v65_v54, %v64_v46  ;;  %v104_v60 = vsel %vm103_vm1, %v52_v52, %v45_v51  ;;  %v73_v61 = vadd.f32 %v72_v55, %v71_v47  ;;  %vm109_vm4 = vcmask 1044484  }
  0x23   :  { %v80_v62 = vadd.f32 %v79_v56, %v78_v48  ;;  %v93_v63 = vrot.slane %v92_v58, 1  ;;  %v87_v0 = vadd.f32 %v86_v57, %v85_v49  ;;  %v106_v1 = vsel %vm105_vm2, %v59_v53, %v104_v60 }
  0x24   :  { %vm111_vm5 = vcmask 1045509   ;;  %v108_v3 = vsel %vm107_vm3, %v66_v59, %v106_v1  ;;  %vm113_vm6 = vcmask 1046534   ;;  %vm115_vm7 = vcmask 1047559  }
  0x25   :  { %v94_v2 = vadd.f32 %v93_v63, %v92_v58  ;;  %v110_v4 = vsel %vm109_vm4, %v73_v61, %v108_v3 }
  0x26   :  { %v112_v6 = vsel %vm111_vm5, %v80_v62, %v110_v4 }
  0x27   :  { %v114_v7 = vsel %vm113_vm6, %v87_v0, %v112_v6 }
  0x28   :  { %v116_v8 = vsel %vm115_vm7, %v94_v2, %v114_v7 }
  0x29   :  { %v118_v9 = vadd.f32 %v116_v8, %v29_v5 }
  0x2b   :  { %119 = vst.msk [vmem:[#allocation2] sm:$0xff] %vm27_vm0, %v118_v9 }
  0x32   :  { %v123_v10 = vld [vmem:[#allocation2] sm:$0xff] }
  0x33   :  { %v124_v11 = vmul.f32 0.125, %v123_v10 }
  0x35   :  { %125 = vst.msk [vmem:[#allocation6] sm:$0xff] %vm27_vm0, %v124_v11 }
  0x36   :  { %179 = shalt.err (!%p176_p12)
}
  0x37   :  { %s180_s24 = scalar_lea.hbm %s247_s1, 128 }
  0x38   :  { %p181_p13 = scmp.ne.s32.totalorder %s247_s1, %s180_s24  ;;  %p184_p0 = scmp.lt.u32.totalorder %s180_s24, %s247_s1 }
  0x3a   :  { %p186_p1 = pnand %p184_p0, %p181_p13 }
  0x3c   :  { %189 = shalt.err (!%p186_p1)
}
  0x3d   :  { %135 = dma.vmem_to_hbm [thread:$0]  %s133_s20, 128, %s247_s1, [#allocation5]  }
  0x3e   :  { %192 = dma.done.wait [#allocation5], 128  }
  0x3f   :  { %193 = vsyncadd [#allocation5], 4294967168 }
  0x40   :  { %139 = vsyncpa [#allocation4], 1 }
  0x41   :  { %140 = vsyncpa [#allocation5], 1 }

</bundles_post_ra>
